<compile_context>
chip_gen: v5e
topology: v5e:2x2
jax: 0.10.0
libtpu: 0.0.40
codegen_flags: <defaults>
</compile_context>

<pallas_src>
import functools

import jax
import jax.numpy as jnp
from jax import lax
from jax.experimental import pallas as pl
from jax.experimental.pallas import tpu as pltpu


MAX_LANE_TILE = 2048  # lanes per block (multiple of 128); full dim if smaller


# ----------------------------------------------------------------------------
# Pallas kernels (all operate on (C, lanes) tiles)
# ----------------------------------------------------------------------------
def _conv1x1_kernel(x_ref, w_ref, b_ref, o_ref):
    # o = w @ x + b ;  x: (1, Cin, tn), w: (Cout, Cin), b: (Cout, 1)
    acc = jnp.dot(w_ref[...], x_ref[0], preferred_element_type=jnp.float32)
    o_ref[0] = (acc + b_ref[...]).astype(o_ref.dtype)


def _theta_attn_kernel(xs_ref, phi_ref, tw_ref, pw_ref, pb_ref, o_ref):
    # theta (strided conv as matmul) + phi, relu, psi (VPU mul + sublane
    # reduce), sigmoid -- fully fused, no HBM round trip for theta_x.
    theta = jnp.dot(tw_ref[...], xs_ref[0], preferred_element_type=jnp.float32)  # (Cx, tn)
    f = jnp.maximum(theta + phi_ref[0].astype(jnp.float32), 0.0)                 # (Cx, tn)
    logits = jnp.sum(f * pw_ref[...], axis=0, keepdims=True) + pb_ref[...]       # (1, tn)
    o_ref[0] = jax.nn.sigmoid(logits).astype(o_ref.dtype)


def _gate_w_gn_kernel(x_ref, a_ref, w_ref, b_ref, g_ref, bt_ref, o_ref,
                      *, groups, eps):
    # y = W @ (att * x) + b ; then GroupNorm(groups, C) over (group chans, S).
    xv = x_ref[0].astype(jnp.float32)            # (Cx, S)
    att = a_ref[0].astype(jnp.float32)           # (1, S) -> broadcast over chans
    y = jnp.dot(w_ref[...], xv * att, preferred_element_type=jnp.float32)
    y = y + b_ref[...]                           # (Cx, S)
    C, S = y.shape
    cg = C // groups
    count = float(cg * S)
    for gi in range(groups):                     # groups is small & static
        ys = y[gi * cg:(gi + 1) * cg, :]
        m = jnp.sum(ys) / count
        yc = ys - m                              # two-pass (centred) variance
        var = jnp.sum(yc * yc) / count
        inv = lax.rsqrt(var + eps)
        gam = g_ref[gi * cg:(gi + 1) * cg, :]
        bet = bt_ref[gi * cg:(gi + 1) * cg, :]
        o_ref[0, gi * cg:(gi + 1) * cg, :] = (yc * inv * gam + bet).astype(o_ref.dtype)


# ----------------------------------------------------------------------------
# Pallas wrappers
# ----------------------------------------------------------------------------
def _round_up(n, m):
    return (n + m - 1) // m * m


def _lane_tiling(n):
    """Return (tile, padded_n): full-dim block if small, else 2048-lane tiles."""
    if n <= MAX_LANE_TILE:
        return n, n
    return MAX_LANE_TILE, _round_up(n, MAX_LANE_TILE)


def _pad_lanes(a, n_pad):
    n = a.shape[-1]
    if n_pad == n:
        return a
    return jnp.pad(a, [(0, 0)] * (a.ndim - 1) + [(0, n_pad - n)])


def conv1x1(x_flat, w, b):
    """x_flat: (B, Cin, S) -> (B, Cout, S) with spatial in lanes."""
    B, Cin, S = x_flat.shape
    Cout = w.shape[0]
    tn, Sp = _lane_tiling(S)
    xp = _pad_lanes(x_flat, Sp)
    out = pl.pallas_call(
        _conv1x1_kernel,
        out_shape=jax.ShapeDtypeStruct((B, Cout, Sp), x_flat.dtype),
        grid=(B, Sp // tn),
        in_specs=[
            pl.BlockSpec((1, Cin, tn), lambda bb, i: (bb, 0, i)),
            pl.BlockSpec((Cout, Cin), lambda bb, i: (0, 0)),
            pl.BlockSpec((Cout, 1), lambda bb, i: (0, 0)),
        ],
        out_specs=pl.BlockSpec((1, Cout, tn), lambda bb, i: (bb, 0, i)),
        compiler_params=pltpu.CompilerParams(
            dimension_semantics=("parallel", "parallel")),
    )(xp, w, b)
    return out[:, :, :S] if Sp != S else out


def theta_attn(xs, phi_up, theta_w, psi_w, psi_b):
    """xs: (B, 8*Cx, Nt), phi_up: (B, Cx, Nt) -> att (B, 1, Nt) lane-dense."""
    B, K, Nt = xs.shape
    Cx = theta_w.shape[0]
    tn, Np = _lane_tiling(Nt)
    xsp = _pad_lanes(xs, Np)
    php = _pad_lanes(phi_up, Np)
    out = pl.pallas_call(
        _theta_attn_kernel,
        out_shape=jax.ShapeDtypeStruct((B, 1, Np), xs.dtype),
        grid=(B, Np // tn),
        in_specs=[
            pl.BlockSpec((1, K, tn), lambda bb, i: (bb, 0, i)),
            pl.BlockSpec((1, Cx, tn), lambda bb, i: (bb, 0, i)),
            pl.BlockSpec((Cx, K), lambda bb, i: (0, 0)),
            pl.BlockSpec((Cx, 1), lambda bb, i: (0, 0)),
            pl.BlockSpec((1, 1), lambda bb, i: (0, 0)),
        ],
        out_specs=pl.BlockSpec((1, 1, tn), lambda bb, i: (bb, 0, i)),
        compiler_params=pltpu.CompilerParams(
            dimension_semantics=("parallel", "parallel")),
    )(xsp, php, theta_w, psi_w, psi_b)
    return out[:, :, :Nt] if Np != Nt else out


def gate_w_groupnorm(x_flat, att_flat, w, b, gamma, beta, groups, eps=1e-5):
    """x_flat: (B, Cx, N), att_flat: (B, 1, N) -> (B, Cx, N)."""
    B, Cx, N = x_flat.shape
    kernel = functools.partial(_gate_w_gn_kernel, groups=groups, eps=eps)
    return pl.pallas_call(
        kernel,
        out_shape=jax.ShapeDtypeStruct((B, Cx, N), x_flat.dtype),
        grid=(B,),
        in_specs=[
            pl.BlockSpec((1, Cx, N), lambda bb: (bb, 0, 0)),
            pl.BlockSpec((1, 1, N), lambda bb: (bb, 0, 0)),
            pl.BlockSpec((Cx, Cx), lambda bb: (0, 0)),
            pl.BlockSpec((Cx, 1), lambda bb: (0, 0)),
            pl.BlockSpec((Cx, 1), lambda bb: (0, 0)),
            pl.BlockSpec((Cx, 1), lambda bb: (0, 0)),
        ],
        out_specs=pl.BlockSpec((1, Cx, N), lambda bb: (bb, 0, 0)),
        compiler_params=pltpu.CompilerParams(dimension_semantics=("parallel",)),
    )(x_flat, att_flat, w, b, gamma, beta)


# ----------------------------------------------------------------------------
# Plain-JAX glue (trilinear resize, PyTorch align_corners=False semantics)
# ----------------------------------------------------------------------------
def _linear_resize_axis(x, out_size, axis):
    in_size = x.shape[axis]
    if in_size == out_size:
        return x
    scale = in_size / out_size
    dst = jnp.arange(out_size, dtype=jnp.float32)
    src = jnp.maximum(scale * (dst + 0.5) - 0.5, 0.0)
    i0 = jnp.clip(jnp.floor(src).astype(jnp.int32), 0, in_size - 1)
    i1 = jnp.minimum(i0 + 1, in_size - 1)
    w1 = src - i0.astype(jnp.float32)
    w0 = 1.0 - w1
    x0 = jnp.take(x, i0, axis=axis)
    x1 = jnp.take(x, i1, axis=axis)
    bshape = [1] * x.ndim
    bshape[axis] = out_size
    return x0 * w0.reshape(bshape) + x1 * w1.reshape(bshape)


def trilinear_resize(x, out_dhw):
    # x: (B, C, D, H, W) channel-first; separable == trilinear
    x = _linear_resize_axis(x, out_dhw[0], axis=2)
    x = _linear_resize_axis(x, out_dhw[1], axis=3)
    x = _linear_resize_axis(x, out_dhw[2], axis=4)
    return x


# ----------------------------------------------------------------------------
# Parameters & forward pass
# ----------------------------------------------------------------------------
def init_params(key, x_ch, g_ch):
    ks = jax.random.split(key, 8)
    s = 0.1
    return {
        # theta: PyTorch (Cout, Cin, 2, 2, 2) -> (Cout, Cin*8), order (ci,kd,kh,kw)
        "theta_w": s * jax.random.normal(ks[0], (x_ch, 8 * x_ch), jnp.float32),
        "phi_w": s * jax.random.normal(ks[1], (x_ch, g_ch), jnp.float32),
        "phi_b": s * jax.random.normal(ks[2], (x_ch, 1), jnp.float32),
        "psi_w": s * jax.random.normal(ks[3], (x_ch, 1), jnp.float32),
        "psi_b": s * jax.random.normal(ks[4], (1, 1), jnp.float32),
        "W_w": s * jax.random.normal(ks[5], (x_ch, x_ch), jnp.float32),
        "W_b": s * jax.random.normal(ks[6], (x_ch, 1), jnp.float32),
        "gn_gamma": 1.0 + s * jax.random.normal(ks[7], (x_ch, 1), jnp.float32),
        "gn_beta": jnp.zeros((x_ch, 1), jnp.float32),
    }


def grid_attention_block_3d(x, g, params, groups=4, eps=1e-5):
    """x: (B, Cx, D, H, W), g: (B, Cg, Dg, Hg, Wg); sub_sample_factor=(2,2,2)."""
    B, Cx, D, H, W = x.shape
    Cg, Dg, Hg, Wg = g.shape[1], g.shape[2], g.shape[3], g.shape[4]
    Dt, Ht, Wt = D // 2, H // 2, W // 2
    Nt = Dt * Ht * Wt
    N = D * H * W

    # phi: 1x1x1 conv on g, then trilinear upsample to theta's spatial size
    g_flat = g.reshape(B, Cg, Dg * Hg * Wg)
    phi_g = conv1x1(g_flat, params["phi_w"], params["phi_b"])          # (B, Cx, Sg)
    phi_g = phi_g.reshape(B, Cx, Dg, Hg, Wg)
    phi_up = trilinear_resize(phi_g, (Dt, Ht, Wt)).reshape(B, Cx, Nt)

    # theta: strided 2x2x2 conv (no bias) == space-to-depth + matmul
    xs = x.reshape(B, Cx, Dt, 2, Ht, 2, Wt, 2)
    xs = xs.transpose(0, 1, 3, 5, 7, 2, 4, 6).reshape(B, 8 * Cx, Nt)
    # TODO(synk): avoid this HBM copy via 8 accumulated offset matmuls in-kernel.

    # fused: theta matmul + add phi + relu + psi + sigmoid
    att = theta_attn(xs, phi_up, params["theta_w"],
                     params["psi_w"], params["psi_b"])                 # (B, 1, Nt)
    att = att.reshape(B, 1, Dt, Ht, Wt)

    # upsample attention map to full resolution (lane-dense in this layout)
    att_up = trilinear_resize(att, (D, H, W)).reshape(B, 1, N)

    # fused: gating (att*x) + W 1x1 conv + GroupNorm(4, Cx)
    out = gate_w_groupnorm(x.reshape(B, Cx, N), att_up,
                           params["W_w"], params["W_b"],
                           params["gn_gamma"], params["gn_beta"],
                           groups=groups, eps=eps)
    return out.reshape(B, Cx, D, H, W)


if __name__ == "__main__":
    key = jax.random.PRNGKey(0)
    B, Cx, D, H, W = 2, 8, 8, 8, 8
    Cg, Dg, Hg, Wg = 16, 2, 2, 2

    kx, kg, kp = jax.random.split(key, 3)
    x = jax.random.normal(kx, (B, Cx, D, H, W), jnp.float32)
    g = jax.random.normal(kg, (B, Cg, Dg, Hg, Wg), jnp.float32)
    params = init_params(kp, Cx, Cg)

    out = jax.jit(grid_attention_block_3d)(x, g, params)
    out = jax.block_until_ready(out)
    assert out.shape == (B, Cx, D, H, W)
    assert bool(jnp.all(jnp.isfinite(out)))
    print("KERNEL_OK")
</pallas_src>

<mosaic_0001>
module attributes {stable_mosaic.version = 11 : i64} {
  func.func @_conv1x1_kernel(%arg0: i32, %arg1: i32, %arg2: memref<1x16x8xf32, #tpu.memory_space<vmem>>, %arg3: memref<8x16xf32, #tpu.memory_space<vmem>>, %arg4: memref<8x1xf32, #tpu.memory_space<vmem>>, %arg5: memref<1x8x8xf32, #tpu.memory_space<vmem>>) attributes {dimension_semantics = [#tpu.dimension_semantics<parallel>, #tpu.dimension_semantics<parallel>], iteration_bounds = array<i64: 2, 1>, scalar_prefetch = 0 : i64, scratch_operands = 0 : i64, tpu.core_type = #tpu.core_type<tc>, window_params = [{transform_indices = @transform_0, window_bounds = array<i64: 1, 16, 8>}, {pipeline_mode = #tpu.pipeline_mode<synchronous>, transform_indices = @transform_1, window_bounds = array<i64: 8, 16>}, {pipeline_mode = #tpu.pipeline_mode<synchronous>, transform_indices = @transform_2, window_bounds = array<i64: 8, 1>}, {transform_indices = @transform_3, window_bounds = array<i64: 1, 8, 8>}]} {
    %c0 = arith.constant 0 : index
    %c0_0 = arith.constant 0 : index
    %0 = vector.load %arg3[%c0, %c0_0] : memref<8x16xf32, #tpu.memory_space<vmem>>, vector<8x16xf32>
    %c0_1 = arith.constant 0 : index
    %c0_2 = arith.constant 0 : index
    %c0_3 = arith.constant 0 : index
    %1 = vector.load %arg2[%c0_1, %c0_2, %c0_3] : memref<1x16x8xf32, #tpu.memory_space<vmem>>, vector<1x16x8xf32>
    %2 = vector.shape_cast %1 : vector<1x16x8xf32> to vector<16x8xf32>
    %cst = arith.constant dense<0.000000e+00> : vector<8x8xf32>
    %3 = tpu.matmul %0, %2, %cst {dimension_numbers = #tpu.dot_dimension_numbers<[1], [0], [0], [1], [0, 0, 1, 1], [], []>} : vector<8x16xf32>, vector<16x8xf32>, vector<8x8xf32> -> vector<8x8xf32>
    %c0_4 = arith.constant 0 : index
    %c0_5 = arith.constant 0 : index
    %4 = vector.load %arg4[%c0_4, %c0_5] : memref<8x1xf32, #tpu.memory_space<vmem>>, vector<8x1xf32>
    %5 = vector.broadcast %4 : vector<8x1xf32> to vector<8x8xf32>
    %6 = arith.addf %3, %5 : vector<8x8xf32>
    %c0_6 = arith.constant 0 : index
    %c0_7 = arith.constant 0 : index
    %c0_8 = arith.constant 0 : index
    %7 = vector.load %arg5[%c0_6, %c0_7, %c0_8] : memref<1x8x8xf32, #tpu.memory_space<vmem>>, vector<1x8x8xf32>
    %8 = vector.shape_cast %7 : vector<1x8x8xf32> to vector<8x8xf32>
    %9 = vector.shape_cast %6 : vector<8x8xf32> to vector<1x8x8xf32>
    tpu.vector_store %arg5[%c0_6, %c0_7, %c0_8], %9 {strides = array<i32>} : memref<1x8x8xf32, #tpu.memory_space<vmem>>, vector<1x8x8xf32>,
    return
  }
  func.func @transform_0(%arg0: i32, %arg1: i32) -> (i32, i32, i32) {
    %c0_i32 = arith.constant 0 : i32
    %c0_i32_0 = arith.constant 0 : i32
    return %arg0, %c0_i32, %arg1 : i32, i32, i32
  }
  func.func @transform_1(%arg0: i32, %arg1: i32) -> (i32, i32) {
    %c0_i32 = arith.constant 0 : i32
    %c0_i32_0 = arith.constant 0 : i32
    %c0_i32_1 = arith.constant 0 : i32
    return %c0_i32, %c0_i32_0 : i32, i32
  }
  func.func @transform_2(%arg0: i32, %arg1: i32) -> (i32, i32) {
    %c0_i32 = arith.constant 0 : i32
    %c0_i32_0 = arith.constant 0 : i32
    %c0_i32_1 = arith.constant 0 : i32
    return %c0_i32, %c0_i32_0 : i32, i32
  }
  func.func @transform_3(%arg0: i32, %arg1: i32) -> (i32, i32, i32) {
    %c0_i32 = arith.constant 0 : i32
    %c0_i32_0 = arith.constant 0 : i32
    return %arg0, %c0_i32, %arg1 : i32, i32, i32
  }
}

module attributes {stable_mosaic.version = 11 : i64} {
  func.func @_theta_attn_kernel(%arg0: i32, %arg1: i32, %arg2: memref<1x64x64xf32, #tpu.memory_space<vmem>>, %arg3: memref<1x8x64xf32, #tpu.memory_space<vmem>>, %arg4: memref<8x64xf32, #tpu.memory_space<vmem>>, %arg5: memref<8x1xf32, #tpu.memory_space<vmem>>, %arg6: memref<1x1xf32, #tpu.memory_space<vmem>>, %arg7: memref<1x1x64xf32, #tpu.memory_space<vmem>>) attributes {dimension_semantics = [#tpu.dimension_semantics<parallel>, #tpu.dimension_semantics<parallel>], iteration_bounds = array<i64: 2, 1>, scalar_prefetch = 0 : i64, scratch_operands = 0 : i64, tpu.core_type = #tpu.core_type<tc>, window_params = [{transform_indices = @transform_0, window_bounds = array<i64: 1, 64, 64>}, {transform_indices = @transform_1, window_bounds = array<i64: 1, 8, 64>}, {pipeline_mode = #tpu.pipeline_mode<synchronous>, transform_indices = @transform_2, window_bounds = array<i64: 8, 64>}, {pipeline_mode = #tpu.pipeline_mode<synchronous>, transform_indices = @transform_3, window_bounds = array<i64: 8, 1>}, {pipeline_mode = #tpu.pipeline_mode<synchronous>, transform_indices = @transform_4, window_bounds = array<i64: 1, 1>}, {transform_indices = @transform_5, window_bounds = array<i64: 1, 1, 64>}]} {
    %c0 = arith.constant 0 : index
    %c0_0 = arith.constant 0 : index
    %0 = vector.load %arg4[%c0, %c0_0] : memref<8x64xf32, #tpu.memory_space<vmem>>, vector<8x64xf32>
    %c0_1 = arith.constant 0 : index
    %c0_2 = arith.constant 0 : index
    %c0_3 = arith.constant 0 : index
    %1 = vector.load %arg2[%c0_1, %c0_2, %c0_3] : memref<1x64x64xf32, #tpu.memory_space<vmem>>, vector<1x64x64xf32>
    %2 = vector.shape_cast %1 : vector<1x64x64xf32> to vector<64x64xf32>
    %cst = arith.constant dense<0.000000e+00> : vector<8x64xf32>
    %3 = tpu.matmul %0, %2, %cst {dimension_numbers = #tpu.dot_dimension_numbers<[1], [0], [0], [1], [0, 0, 1, 1], [], []>} : vector<8x64xf32>, vector<64x64xf32>, vector<8x64xf32> -> vector<8x64xf32>
    %c0_4 = arith.constant 0 : index
    %c0_5 = arith.constant 0 : index
    %c0_6 = arith.constant 0 : index
    %4 = vector.load %arg3[%c0_4, %c0_5, %c0_6] : memref<1x8x64xf32, #tpu.memory_space<vmem>>, vector<1x8x64xf32>
    %5 = vector.shape_cast %4 : vector<1x8x64xf32> to vector<8x64xf32>
    %6 = arith.addf %3, %5 : vector<8x64xf32>
    %cst_7 = arith.constant 0.000000e+00 : f32
    %7 = vector.broadcast %cst_7 : f32 to vector<8x64xf32>
    %8 = arith.maximumf %6, %7 : vector<8x64xf32>
    %c0_8 = arith.constant 0 : index
    %c0_9 = arith.constant 0 : index
    %9 = vector.load %arg5[%c0_8, %c0_9] : memref<8x1xf32, #tpu.memory_space<vmem>>, vector<8x1xf32>
    %10 = vector.broadcast %9 : vector<8x1xf32> to vector<8x64xf32>
    %11 = arith.mulf %8, %10 : vector<8x64xf32>
    %cst_10 = arith.constant dense<0.000000e+00> : vector<64xf32>
    %12 = vector.multi_reduction <add>, %11, %cst_10 [0] : vector<8x64xf32> to vector<64xf32>
    %13 = vector.shape_cast %12 : vector<64xf32> to vector<1x64xf32>
    %c0_11 = arith.constant 0 : index
    %c0_12 = arith.constant 0 : index
    %14 = vector.load %arg6[%c0_11, %c0_12] : memref<1x1xf32, #tpu.memory_space<vmem>>, vector<1x1xf32>
    %15 = vector.broadcast %14 : vector<1x1xf32> to vector<1x64xf32>
    %16 = arith.addf %13, %15 : vector<1x64xf32>
    %17 = arith.negf %16 : vector<1x64xf32>
    %18 = math.exp %17 : vector<1x64xf32>
    %cst_13 = arith.constant 1.000000e+00 : f32
    %19 = vector.broadcast %cst_13 : f32 to vector<1x64xf32>
    %20 = arith.addf %19, %18 : vector<1x64xf32>
    %21 = arith.divf %19, %20 : vector<1x64xf32>
    %c0_14 = arith.constant 0 : index
    %c0_15 = arith.constant 0 : index
    %c0_16 = arith.constant 0 : index
    %22 = vector.load %arg7[%c0_14, %c0_15, %c0_16] : memref<1x1x64xf32, #tpu.memory_space<vmem>>, vector<1x1x64xf32>
    %23 = vector.shape_cast %22 : vector<1x1x64xf32> to vector<1x64xf32>
    %24 = vector.shape_cast %21 : vector<1x64xf32> to vector<1x1x64xf32>
    tpu.vector_store %arg7[%c0_14, %c0_15, %c0_16], %24 {strides = array<i32>} : memref<1x1x64xf32, #tpu.memory_space<vmem>>, vector<1x1x64xf32>,
    return
  }
  func.func @transform_0(%arg0: i32, %arg1: i32) -> (i32, i32, i32) {
    %c0_i32 = arith.constant 0 : i32
    %c0_i32_0 = arith.constant 0 : i32
    return %arg0, %c0_i32, %arg1 : i32, i32, i32
  }
  func.func @transform_1(%arg0: i32, %arg1: i32) -> (i32, i32, i32) {
    %c0_i32 = arith.constant 0 : i32
    %c0_i32_0 = arith.constant 0 : i32
    return %arg0, %c0_i32, %arg1 : i32, i32, i32
  }
  func.func @transform_2(%arg0: i32, %arg1: i32) -> (i32, i32) {
    %c0_i32 = arith.constant 0 : i32
    %c0_i32_0 = arith.constant 0 : i32
    %c0_i32_1 = arith.constant 0 : i32
    return %c0_i32, %c0_i32_0 : i32, i32
  }
  func.func @transform_3(%arg0: i32, %arg1: i32) -> (i32, i32) {
    %c0_i32 = arith.constant 0 : i32
    %c0_i32_0 = arith.constant 0 : i32
    %c0_i32_1 = arith.constant 0 : i32
    return %c0_i32, %c0_i32_0 : i32, i32
  }
  func.func @transform_4(%arg0: i32, %arg1: i32) -> (i32, i32) {
    %c0_i32 = arith.constant 0 : i32
    %c0_i32_0 = arith.constant 0 : i32
    %c0_i32_1 = arith.constant 0 : i32
    return %c0_i32, %c0_i32_0 : i32, i32
  }
  func.func @transform_5(%arg0: i32, %arg1: i32) -> (i32, i32, i32) {
    %c0_i32 = arith.constant 0 : i32
    %c0_i32_0 = arith.constant 0 : i32
    return %arg0, %c0_i32, %arg1 : i32, i32, i32
  }
}

module attributes {stable_mosaic.version = 11 : i64} {
  func.func @_gate_w_gn_kernel(%arg0: i32, %arg1: memref<1x8x512xf32, #tpu.memory_space<vmem>>, %arg2: memref<1x1x512xf32, #tpu.memory_space<vmem>>, %arg3: memref<8x8xf32, #tpu.memory_space<vmem>>, %arg4: memref<8x1xf32, #tpu.memory_space<vmem>>, %arg5: memref<8x1xf32, #tpu.memory_space<vmem>>, %arg6: memref<8x1xf32, #tpu.memory_space<vmem>>, %arg7: memref<1x8x512xf32, #tpu.memory_space<vmem>>) attributes {dimension_semantics = [#tpu.dimension_semantics<parallel>], iteration_bounds = array<i64: 2>, scalar_prefetch = 0 : i64, scratch_operands = 0 : i64, tpu.core_type = #tpu.core_type<tc>, window_params = [{transform_indices = @transform_0, window_bounds = array<i64: 1, 8, 512>}, {transform_indices = @transform_1, window_bounds = array<i64: 1, 1, 512>}, {pipeline_mode = #tpu.pipeline_mode<synchronous>, transform_indices = @transform_2, window_bounds = array<i64: 8, 8>}, {pipeline_mode = #tpu.pipeline_mode<synchronous>, transform_indices = @transform_3, window_bounds = array<i64: 8, 1>}, {pipeline_mode = #tpu.pipeline_mode<synchronous>, transform_indices = @transform_4, window_bounds = array<i64: 8, 1>}, {pipeline_mode = #tpu.pipeline_mode<synchronous>, transform_indices = @transform_5, window_bounds = array<i64: 8, 1>}, {transform_indices = @transform_6, window_bounds = array<i64: 1, 8, 512>}]} {
    %c0 = arith.constant 0 : index
    %c0_0 = arith.constant 0 : index
    %c0_1 = arith.constant 0 : index
    %0 = vector.load %arg1[%c0, %c0_0, %c0_1] : memref<1x8x512xf32, #tpu.memory_space<vmem>>, vector<1x8x512xf32>
    %1 = vector.shape_cast %0 : vector<1x8x512xf32> to vector<8x512xf32>
    %c0_2 = arith.constant 0 : index
    %c0_3 = arith.constant 0 : index
    %c0_4 = arith.constant 0 : index
    %2 = vector.load %arg2[%c0_2, %c0_3, %c0_4] : memref<1x1x512xf32, #tpu.memory_space<vmem>>, vector<1x1x512xf32>
    %3 = vector.shape_cast %2 : vector<1x1x512xf32> to vector<1x512xf32>
    %c0_5 = arith.constant 0 : index
    %c0_6 = arith.constant 0 : index
    %4 = vector.load %arg3[%c0_5, %c0_6] : memref<8x8xf32, #tpu.memory_space<vmem>>, vector<8x8xf32>
    %5 = vector.broadcast %3 : vector<1x512xf32> to vector<8x512xf32>
    %6 = arith.mulf %1, %5 : vector<8x512xf32>
    %cst = arith.constant dense<0.000000e+00> : vector<8x512xf32>
    %7 = tpu.matmul %4, %6, %cst {dimension_numbers = #tpu.dot_dimension_numbers<[1], [0], [0], [1], [0, 0, 1, 1], [], []>} : vector<8x8xf32>, vector<8x512xf32>, vector<8x512xf32> -> vector<8x512xf32>
    %c0_7 = arith.constant 0 : index
    %c0_8 = arith.constant 0 : index
    %8 = vector.load %arg4[%c0_7, %c0_8] : memref<8x1xf32, #tpu.memory_space<vmem>>, vector<8x1xf32>
    %9 = vector.broadcast %8 : vector<8x1xf32> to vector<8x512xf32>
    %10 = arith.addf %7, %9 : vector<8x512xf32>
    %11 = vector.extract_strided_slice %10 {offsets = [0, 0], sizes = [2, 512], strides = [1, 1]} : vector<8x512xf32> to vector<2x512xf32>
    %12 = vector.shape_cast %11 : vector<2x512xf32> to vector<1x2x512xf32>
    %cst_9 = arith.constant dense<0.000000e+00> : vector<1xf32>
    %13 = vector.multi_reduction <add>, %12, %cst_9 [1, 2] : vector<1x2x512xf32> to vector<1xf32>
    %14 = vector.shape_cast %13 : vector<1xf32> to vector<1x1x1xf32>
    %15 = vector.extract %14[0, 0, 0] : f32 from vector<1x1x1xf32>
    %cst_10 = arith.constant 1.024000e+03 : f32
    %16 = arith.divf %15, %cst_10 : f32
    %17 = vector.broadcast %16 : f32 to vector<2x512xf32>
    %18 = arith.subf %11, %17 : vector<2x512xf32>
    %19 = arith.mulf %18, %18 : vector<2x512xf32>
    %20 = vector.shape_cast %19 : vector<2x512xf32> to vector<1x2x512xf32>
    %cst_11 = arith.constant dense<0.000000e+00> : vector<1xf32>
    %21 = vector.multi_reduction <add>, %20, %cst_11 [1, 2] : vector<1x2x512xf32> to vector<1xf32>
    %22 = vector.shape_cast %21 : vector<1xf32> to vector<1x1x1xf32>
    %23 = vector.extract %22[0, 0, 0] : f32 from vector<1x1x1xf32>
    %cst_12 = arith.constant 1.024000e+03 : f32
    %24 = arith.divf %23, %cst_12 : f32
    %cst_13 = arith.constant 9.99999974E-6 : f32
    %25 = arith.addf %24, %cst_13 : f32
    %26 = math.rsqrt %25 : f32
    %c0_14 = arith.constant 0 : index
    %c0_15 = arith.constant 0 : index
    %27 = vector.load %arg5[%c0_14, %c0_15] : memref<8x1xf32, #tpu.memory_space<vmem>>, vector<2x1xf32>
    %c0_16 = arith.constant 0 : index
    %c0_17 = arith.constant 0 : index
    %28 = vector.load %arg6[%c0_16, %c0_17] : memref<8x1xf32, #tpu.memory_space<vmem>>, vector<2x1xf32>
    %29 = vector.broadcast %26 : f32 to vector<2x512xf32>
    %30 = arith.mulf %18, %29 : vector<2x512xf32>
    %31 = vector.broadcast %27 : vector<2x1xf32> to vector<2x512xf32>
    %32 = arith.mulf %30, %31 : vector<2x512xf32>
    %33 = vector.broadcast %28 : vector<2x1xf32> to vector<2x512xf32>
    %34 = arith.addf %32, %33 : vector<2x512xf32>
    %c0_18 = arith.constant 0 : index
    %c0_19 = arith.constant 0 : index
    %c0_20 = arith.constant 0 : index
    %35 = vector.load %arg7[%c0_18, %c0_19, %c0_20] : memref<1x8x512xf32, #tpu.memory_space<vmem>>, vector<1x2x512xf32>
    %36 = vector.shape_cast %35 : vector<1x2x512xf32> to vector<2x512xf32>
    %37 = vector.shape_cast %34 : vector<2x512xf32> to vector<1x2x512xf32>
    tpu.vector_store %arg7[%c0_18, %c0_19, %c0_20], %37 {strides = array<i32>} : memref<1x8x512xf32, #tpu.memory_space<vmem>>, vector<1x2x512xf32>,
    %38 = vector.extract_strided_slice %10 {offsets = [2, 0], sizes = [2, 512], strides = [1, 1]} : vector<8x512xf32> to vector<2x512xf32>
    %39 = vector.shape_cast %38 : vector<2x512xf32> to vector<1x2x512xf32>
    %cst_21 = arith.constant dense<0.000000e+00> : vector<1xf32>
    %40 = vector.multi_reduction <add>, %39, %cst_21 [1, 2] : vector<1x2x512xf32> to vector<1xf32>
    %41 = vector.shape_cast %40 : vector<1xf32> to vector<1x1x1xf32>
    %42 = vector.extract %41[0, 0, 0] : f32 from vector<1x1x1xf32>
    %cst_22 = arith.constant 1.024000e+03 : f32
    %43 = arith.divf %42, %cst_22 : f32
    %44 = vector.broadcast %43 : f32 to vector<2x512xf32>
    %45 = arith.subf %38, %44 : vector<2x512xf32>
    %46 = arith.mulf %45, %45 : vector<2x512xf32>
    %47 = vector.shape_cast %46 : vector<2x512xf32> to vector<1x2x512xf32>
    %cst_23 = arith.constant dense<0.000000e+00> : vector<1xf32>
    %48 = vector.multi_reduction <add>, %47, %cst_23 [1, 2] : vector<1x2x512xf32> to vector<1xf32>
    %49 = vector.shape_cast %48 : vector<1xf32> to vector<1x1x1xf32>
    %50 = vector.extract %49[0, 0, 0] : f32 from vector<1x1x1xf32>
    %cst_24 = arith.constant 1.024000e+03 : f32
    %51 = arith.divf %50, %cst_24 : f32
    %cst_25 = arith.constant 9.99999974E-6 : f32
    %52 = arith.addf %51, %cst_25 : f32
    %53 = math.rsqrt %52 : f32
    %c2 = arith.constant 2 : index
    %c0_26 = arith.constant 0 : index
    %54 = vector.load %arg5[%c2, %c0_26] : memref<8x1xf32, #tpu.memory_space<vmem>>, vector<2x1xf32>
    %c2_27 = arith.constant 2 : index
    %c0_28 = arith.constant 0 : index
    %55 = vector.load %arg6[%c2_27, %c0_28] : memref<8x1xf32, #tpu.memory_space<vmem>>, vector<2x1xf32>
    %56 = vector.broadcast %53 : f32 to vector<2x512xf32>
    %57 = arith.mulf %45, %56 : vector<2x512xf32>
    %58 = vector.broadcast %54 : vector<2x1xf32> to vector<2x512xf32>
    %59 = arith.mulf %57, %58 : vector<2x512xf32>
    %60 = vector.broadcast %55 : vector<2x1xf32> to vector<2x512xf32>
    %61 = arith.addf %59, %60 : vector<2x512xf32>
    %c0_29 = arith.constant 0 : index
    %c2_30 = arith.constant 2 : index
    %c0_31 = arith.constant 0 : index
    %62 = vector.load %arg7[%c0_29, %c2_30, %c0_31] : memref<1x8x512xf32, #tpu.memory_space<vmem>>, vector<1x2x512xf32>
    %63 = vector.shape_cast %62 : vector<1x2x512xf32> to vector<2x512xf32>
    %64 = vector.shape_cast %61 : vector<2x512xf32> to vector<1x2x512xf32>
    tpu.vector_store %arg7[%c0_29, %c2_30, %c0_31], %64 {strides = array<i32>} : memref<1x8x512xf32, #tpu.memory_space<vmem>>, vector<1x2x512xf32>,
    %65 = vector.extract_strided_slice %10 {offsets = [4, 0], sizes = [2, 512], strides = [1, 1]} : vector<8x512xf32> to vector<2x512xf32>
    %66 = vector.shape_cast %65 : vector<2x512xf32> to vector<1x2x512xf32>
    %cst_32 = arith.constant dense<0.000000e+00> : vector<1xf32>
    %67 = vector.multi_reduction <add>, %66, %cst_32 [1, 2] : vector<1x2x512xf32> to vector<1xf32>
    %68 = vector.shape_cast %67 : vector<1xf32> to vector<1x1x1xf32>
    %69 = vector.extract %68[0, 0, 0] : f32 from vector<1x1x1xf32>
    %cst_33 = arith.constant 1.024000e+03 : f32
    %70 = arith.divf %69, %cst_33 : f32
    %71 = vector.broadcast %70 : f32 to vector<2x512xf32>
    %72 = arith.subf %65, %71 : vector<2x512xf32>
    %73 = arith.mulf %72, %72 : vector<2x512xf32>
    %74 = vector.shape_cast %73 : vector<2x512xf32> to vector<1x2x512xf32>
    %cst_34 = arith.constant dense<0.000000e+00> : vector<1xf32>
    %75 = vector.multi_reduction <add>, %74, %cst_34 [1, 2] : vector<1x2x512xf32> to vector<1xf32>
    %76 = vector.shape_cast %75 : vector<1xf32> to vector<1x1x1xf32>
    %77 = vector.extract %76[0, 0, 0] : f32 from vector<1x1x1xf32>
    %cst_35 = arith.constant 1.024000e+03 : f32
    %78 = arith.divf %77, %cst_35 : f32
    %cst_36 = arith.constant 9.99999974E-6 : f32
    %79 = arith.addf %78, %cst_36 : f32
    %80 = math.rsqrt %79 : f32
    %c4 = arith.constant 4 : index
    %c0_37 = arith.constant 0 : index
    %81 = vector.load %arg5[%c4, %c0_37] : memref<8x1xf32, #tpu.memory_space<vmem>>, vector<2x1xf32>
    %c4_38 = arith.constant 4 : index
    %c0_39 = arith.constant 0 : index
    %82 = vector.load %arg6[%c4_38, %c0_39] : memref<8x1xf32, #tpu.memory_space<vmem>>, vector<2x1xf32>
    %83 = vector.broadcast %80 : f32 to vector<2x512xf32>
    %84 = arith.mulf %72, %83 : vector<2x512xf32>
    %85 = vector.broadcast %81 : vector<2x1xf32> to vector<2x512xf32>
    %86 = arith.mulf %84, %85 : vector<2x512xf32>
    %87 = vector.broadcast %82 : vector<2x1xf32> to vector<2x512xf32>
    %88 = arith.addf %86, %87 : vector<2x512xf32>
    %c0_40 = arith.constant 0 : index
    %c4_41 = arith.constant 4 : index
    %c0_42 = arith.constant 0 : index
    %89 = vector.load %arg7[%c0_40, %c4_41, %c0_42] : memref<1x8x512xf32, #tpu.memory_space<vmem>>, vector<1x2x512xf32>
    %90 = vector.shape_cast %89 : vector<1x2x512xf32> to vector<2x512xf32>
    %91 = vector.shape_cast %88 : vector<2x512xf32> to vector<1x2x512xf32>
    tpu.vector_store %arg7[%c0_40, %c4_41, %c0_42], %91 {strides = array<i32>} : memref<1x8x512xf32, #tpu.memory_space<vmem>>, vector<1x2x512xf32>,
    %92 = vector.extract_strided_slice %10 {offsets = [6, 0], sizes = [2, 512], strides = [1, 1]} : vector<8x512xf32> to vector<2x512xf32>
    %93 = vector.shape_cast %92 : vector<2x512xf32> to vector<1x2x512xf32>
    %cst_43 = arith.constant dense<0.000000e+00> : vector<1xf32>
    %94 = vector.multi_reduction <add>, %93, %cst_43 [1, 2] : vector<1x2x512xf32> to vector<1xf32>
    %95 = vector.shape_cast %94 : vector<1xf32> to vector<1x1x1xf32>
    %96 = vector.extract %95[0, 0, 0] : f32 from vector<1x1x1xf32>
    %cst_44 = arith.constant 1.024000e+03 : f32
    %97 = arith.divf %96, %cst_44 : f32
    %98 = vector.broadcast %97 : f32 to vector<2x512xf32>
    %99 = arith.subf %92, %98 : vector<2x512xf32>
    %100 = arith.mulf %99, %99 : vector<2x512xf32>
    %101 = vector.shape_cast %100 : vector<2x512xf32> to vector<1x2x512xf32>
    %cst_45 = arith.constant dense<0.000000e+00> : vector<1xf32>
    %102 = vector.multi_reduction <add>, %101, %cst_45 [1, 2] : vector<1x2x512xf32> to vector<1xf32>
    %103 = vector.shape_cast %102 : vector<1xf32> to vector<1x1x1xf32>
    %104 = vector.extract %103[0, 0, 0] : f32 from vector<1x1x1xf32>
    %cst_46 = arith.constant 1.024000e+03 : f32
    %105 = arith.divf %104, %cst_46 : f32
    %cst_47 = arith.constant 9.99999974E-6 : f32
    %106 = arith.addf %105, %cst_47 : f32
    %107 = math.rsqrt %106 : f32
    %c6 = arith.constant 6 : index
    %c0_48 = arith.constant 0 : index
    %108 = vector.load %arg5[%c6, %c0_48] : memref<8x1xf32, #tpu.memory_space<vmem>>, vector<2x1xf32>
    %c6_49 = arith.constant 6 : index
    %c0_50 = arith.constant 0 : index
    %109 = vector.load %arg6[%c6_49, %c0_50] : memref<8x1xf32, #tpu.memory_space<vmem>>, vector<2x1xf32>
    %110 = vector.broadcast %107 : f32 to vector<2x512xf32>
    %111 = arith.mulf %99, %110 : vector<2x512xf32>
    %112 = vector.broadcast %108 : vector<2x1xf32> to vector<2x512xf32>
    %113 = arith.mulf %111, %112 : vector<2x512xf32>
    %114 = vector.broadcast %109 : vector<2x1xf32> to vector<2x512xf32>
    %115 = arith.addf %113, %114 : vector<2x512xf32>
    %c0_51 = arith.constant 0 : index
    %c6_52 = arith.constant 6 : index
    %c0_53 = arith.constant 0 : index
    %116 = vector.load %arg7[%c0_51, %c6_52, %c0_53] : memref<1x8x512xf32, #tpu.memory_space<vmem>>, vector<1x2x512xf32>
    %117 = vector.shape_cast %116 : vector<1x2x512xf32> to vector<2x512xf32>
    %118 = vector.shape_cast %115 : vector<2x512xf32> to vector<1x2x512xf32>
    tpu.vector_store %arg7[%c0_51, %c6_52, %c0_53], %118 {strides = array<i32>} : memref<1x8x512xf32, #tpu.memory_space<vmem>>, vector<1x2x512xf32>,
    return
  }
  func.func @transform_0(%arg0: i32) -> (i32, i32, i32) {
    %c0_i32 = arith.constant 0 : i32
    %c0_i32_0 = arith.constant 0 : i32
    %c0_i32_1 = arith.constant 0 : i32
    return %arg0, %c0_i32, %c0_i32_0 : i32, i32, i32
  }
  func.func @transform_1(%arg0: i32) -> (i32, i32, i32) {
    %c0_i32 = arith.constant 0 : i32
    %c0_i32_0 = arith.constant 0 : i32
    %c0_i32_1 = arith.constant 0 : i32
    return %arg0, %c0_i32, %c0_i32_0 : i32, i32, i32
  }
  func.func @transform_2(%arg0: i32) -> (i32, i32) {
    %c0_i32 = arith.constant 0 : i32
    %c0_i32_0 = arith.constant 0 : i32
    %c0_i32_1 = arith.constant 0 : i32
    return %c0_i32, %c0_i32_0 : i32, i32
  }
  func.func @transform_3(%arg0: i32) -> (i32, i32) {
    %c0_i32 = arith.constant 0 : i32
    %c0_i32_0 = arith.constant 0 : i32
    %c0_i32_1 = arith.constant 0 : i32
    return %c0_i32, %c0_i32_0 : i32, i32
  }
  func.func @transform_4(%arg0: i32) -> (i32, i32) {
    %c0_i32 = arith.constant 0 : i32
    %c0_i32_0 = arith.constant 0 : i32
    %c0_i32_1 = arith.constant 0 : i32
    return %c0_i32, %c0_i32_0 : i32, i32
  }
  func.func @transform_5(%arg0: i32) -> (i32, i32) {
    %c0_i32 = arith.constant 0 : i32
    %c0_i32_0 = arith.constant 0 : i32
    %c0_i32_1 = arith.constant 0 : i32
    return %c0_i32, %c0_i32_0 : i32, i32
  }
  func.func @transform_6(%arg0: i32) -> (i32, i32, i32) {
    %c0_i32 = arith.constant 0 : i32
    %c0_i32_0 = arith.constant 0 : i32
    %c0_i32_1 = arith.constant 0 : i32
    return %arg0, %c0_i32, %c0_i32_0 : i32, i32, i32
  }
}

</mosaic_0001>

<bundles_post_ra>
// kernel: grid_attention_block_3d.3
= control target key start
LH: loop header
LB: loop body
LE: loop exit
PB: predicated region body
PF: predicated region fallthrough
CT: control target
= control target key end

     0   :  { %s395_s12 = smov 0   ;;  %s397_s13 = smov 0   ;;  %s431_s0 = inlined_call_operand.vmem [shape: f32[2,16,8], index: 0, kind: input, shape index: {}]   ;;  %s432_s1 = inlined_call_operand.vmem [shape: f32[8,16], index: 1, kind: input, shape index: {}]   ;;  %s433_s2 = inlined_call_operand.vmem [shape: f32[8,1], index: 2, kind: input, shape index: {}]   ;;  %s434_s3 = inlined_call_operand.vmem [shape: f32[2,8,8], index: 3, kind: output, shape index: {}]  }
   0x1   :  { %s399_s14 = smov 0  }
   0x2 LB: > { %s25_s15 = sadd.s32 1, %s368_s13  ;;  %p316_p0 = scmp.ge.s32.totalorder %s372_s14, 1  ;;  %s372_s14 = sphi %s399_s14, %s13_s14   ;;  %s368_s13 = sphi %s397_s13, %s436_s13   ;;  %s364_s12 = sphi %s395_s12, %s435_s12  }
   0x3   : > { %p27_p1 = scmp.ge.s32.totalorder %s25_s15, 2  ;;  %p156_p2 = scmp.lt.s32.totalorder %s372_s14, 3 }
   0x5   : > { %s438_s15 = smov (%p27_p1, %s25_s15), 0  ;;  %p157_p3 = pnand %p316_p0, %p156_p2 }
   0x6   : > { %p185_p4 = scmp.lt.s32.totalorder (!%p157_p3), %s364_s12, 1 }
   0x7   : > { %160 = sbr.rel (%p157_p3) target bundleno = 148 (0x94), region = 32 }
   0xc   : > { %v203_v0 = vld [vmem:[%s433_s2] sm:$0xff]  ;;  %v374_v1 = vmov 0   ;;  %s440_s12 = smov (!%p185_p4, %s364_s12), 1  ;;  %vm209_vm0 = vcmask 130048   ;;  %vm233_vm1 = vcmask 64512  }
   0xd   : > { %349 = vset.pattern.permute.xlu0 %v374_v1  ;;  %s323_s18 = sshll.u32 %s440_s12, 4  ;;  %v200_v4 = vld [vmem:[%s432_s1] sm:$0xff]  ;;  %s319_s24 = sshll.u32 %s440_s12, 3 }
   0xe   : > { %206 = vperm.xlu0 %349, %v203_v0   ;;  %s192_s21 = scalar_lea.vmem %s431_s0, %s323_s18  ;;  %s199_s27 = scalar_lea.vmem %s434_s3, %s319_s24 }
   0xf   : > { %v202_v2 = vld [vmem:[%s192_s21 + $0x8] sm:$0xff]  ;;  %v201_v3 = vld [vmem:[%s192_s21] sm:$0xff] }
  0x10   : > { %227 = vmatpush.msra.mxu0 %v202_v2 }
  0x12   : > { %228 = vmatpush.msra.mxu0 %v201_v3 }
  0x13   : > { %320 = vmatmul.msk.f32.vlgmr.msra.gmra.mxu0 %vm209_vm0, %v200_v4 }
  0x80   : > { %v207_v5 = vpop.permute.xlu0 %206 }
  0x90   : > { %v230_v6 = vpop.f32.mrf.mxu0 }
  0x91   : > { %v231_v7 = vadd.f32 %v230_v6, %v207_v5 }
  0x93   : > { %234 = vst.msk [vmem:[%s199_s27] sm:$0xff] %vm233_vm1, %v231_v7 }
  0x94 PF: > { %s13_s14 = sadd.s32 1, %s372_s14   ;;  %s435_s12 = smov %s368_s13 }
  0x95   : > { %p10_p5 = scmp.ge.s32.totalorder %s13_s14, 4   ;;  %s436_s13 = smov %s438_s15 }
  0x97   :  { %12 = sbr.rel (!%p10_p5) target bundleno = 2 (0x2), region = 62 }

// kernel: grid_attention_block_3d.4
= control target key start
LH: loop header
LB: loop body
LE: loop exit
PB: predicated region body
PF: predicated region fallthrough
CT: control target
= control target key end

     0   :  { %s547_s20 = smov 0   ;;  %s549_s21 = smov 0   ;;  %s594_s0 = inlined_call_operand.vmem [shape: f32[2,64,64], index: 0, kind: input, shape index: {}]   ;;  %s595_s1 = inlined_call_operand.vmem [shape: f32[2,8,64], index: 1, kind: input, shape index: {}]   ;;  %s596_s2 = inlined_call_operand.vmem [shape: f32[8,64], index: 2, kind: input, shape index: {}]   ;;  %s597_s3 = inlined_call_operand.vmem [shape: f32[8,1], index: 3, kind: input, shape index: {}]   ;;  %s598_s4 = inlined_call_operand.<no memory space> [shape: f32[1,1], index: 4, kind: input, shape index: {}]   ;;  %s599_s5 = inlined_call_operand.vmem [shape: f32[2,1,64], index: 5, kind: output, shape index: {}]  }
   0x1   :  { %v10_v0 = vstv %s598_s4  ;;  %s551_s22 = smov 0  }
   0x2   :  { %11 = vst [vmem:[#allocation2] sm:$0x1] %v10_v0 }
   0x3 LB: > { %s29_s4 = sadd.s32 1, %s507_s21  ;;  %p450_p0 = scmp.ge.s32.totalorder %s511_s22, 1  ;;  %s511_s22 = sphi %s551_s22, %s17_s22   ;;  %s507_s21 = sphi %s549_s21, %s601_s21   ;;  %s503_s20 = sphi %s547_s20, %s600_s20  }
   0x4   : > { %p31_p1 = scmp.ge.s32.totalorder %s29_s4, 2  ;;  %p222_p2 = scmp.lt.s32.totalorder %s511_s22, 3 }
   0x6   : > { %s603_s4 = smov (%p31_p1, %s29_s4), 0  ;;  %p223_p3 = pnand %p450_p0, %p222_p2 }
   0x7   : > { %p261_p4 = scmp.lt.s32.totalorder (!%p223_p3), %s503_s20, 1 }
   0x8   : > { %226 = sbr.rel (%p223_p3) target bundleno = 208 (0xd0), region = 40 }
   0xd   : > { %v317_v1 = vld [vmem:[%s597_s3] sm:$0xff]  ;;  %v513_v2 = vmov 0   ;;  %s605_s20 = smov (!%p261_p4, %s503_s20), 1  ;;  %vm292_vm0 = vcmask 523264   ;;  %vm358_vm3 = vcmask 516096  }
   0xe   : > { %484 = vset.pattern.permute.xlu0 %v513_v2  ;;  %s458_s25 = sshll.u32 %s605_s20, 6  ;;  %v331_v5 = vld [vmem:[#allocation2] sm:$0x1]  ;;  %s453_s6 = sshll.u32 %s605_s20, 3 }
   0xf   : > { %320 = vperm.xlu0 %484, %v317_v1   ;;  %s268_s28 = scalar_lea.vmem %s594_s0, %s458_s25  ;;  %v282_v12 = vld [vmem:[%s596_s2] sm:$0xff]  ;;  %s275_s9 = scalar_lea.vmem %s595_s1, %s453_s6 }
  0x10   : > { %v290_v3 = vld [vmem:[%s268_s28 + $0x38] sm:$0xff]  ;;  %v289_v4 = vld [vmem:[%s268_s28 + $0x30] sm:$0xff]  ;;  %v288_v6 = vld [vmem:[%s268_s28 + $0x28] sm:$0xff]  ;;  %s281_s12 = scalar_lea.vmem %s599_s5, %s605_s20 }
  0x11   : > { %304 = vmatpush.msra.mxu0 %v290_v3  ;;  %v287_v7 = vld [vmem:[%s268_s28 + $0x20] sm:$0xff]  ;;  %v286_v8 = vld [vmem:[%s268_s28 + $0x18] sm:$0xff]  ;;  %v285_v9 = vld [vmem:[%s268_s28 + $0x10] sm:$0xff] }
  0x12   : > { %v284_v10 = vld [vmem:[%s268_s28 + $0x8] sm:$0xff]  ;;  %v283_v11 = vld [vmem:[%s268_s28] sm:$0xff] }
  0x13   : > { %305 = vmatpush.msra.mxu0 %v289_v4  ;;  %v291_v13 = vld [vmem:[%s275_s9] sm:$0xff] }
  0x15   : > { %306 = vmatpush.msra.mxu0 %v288_v6 }
  0x17   : > { %334 = vperm.xlu0 %484, %v331_v5   ;;  %307 = vmatpush.msra.mxu0 %v287_v7 }
  0x19   : > { %308 = vmatpush.msra.mxu0 %v286_v8 }
  0x1b   : > { %309 = vmatpush.msra.mxu0 %v285_v9 }
  0x1d   : > { %310 = vmatpush.msra.mxu0 %v284_v10 }
  0x1f   : > { %311 = vmatpush.msra.mxu0 %v283_v11 }
  0x20   : > { %454 = vmatmul.msk.f32.vlgmr.msra.gmra.mxu0 %vm292_vm0, %v282_v12 }
  0x81   : > { %v321_v17 = vpop.permute.xlu0 %320 }
  0x89   : > { %v335_v24 = vpop.permute.xlu0 %334 }
  0x8a   : > { %v337_v27 = vperm.slane %v335_v24, 0 }
  0x9d   : > { %v313_v14 = vpop.f32.mrf.mxu0 }
  0x9e   : > { %v314_v15 = vadd.f32 %v313_v14, %v291_v13 }
  0xa0   : > { %v316_v16 = vmax.f32 %v314_v15, 0.0 }
  0xa2   : > { %v323_v18 = vmul.f32 %v321_v17, %v316_v16 }
  0xa4   : > { %v324_v19 = vsel %vm292_vm0, %v323_v18, 0.0 }
  0xa5   : > { %v325_v20 = vrot.slane %v324_v19, 4 }
  0xa7   : > { %v326_v21 = vadd.f32 %v325_v20, %v324_v19 }
  0xa9   : > { %v327_v22 = vrot.slane %v326_v21, 2 }
  0xab   : > { %v328_v23 = vadd.f32 %v327_v22, %v326_v21 }
  0xad   : > { %v329_v25 = vrot.slane %v328_v23, 1 }
  0xaf   : > { %v330_v26 = vadd.f32 %v329_v25, %v328_v23 }
  0xb1   : > { %v338_v28 = vadd.f32 %v337_v27, %v330_v26 }
  0xb3   : > { %v455_v29 = vmul.f32 -1.442695, %v338_v28 }
  0xb5   : > { %485 = vpow2.f32 %v455_v29 }
  0xbb   : > { %v486_v30 = vpop.eup %485 }
  0xbc   : > { %v342_v31 = vadd.f32 1.0, %v486_v30 }
  0xbe   : > { %487 = vrcp.f32 %v342_v31  ;;  %v354_v35 = vand.u32 2147483648, %v342_v31  ;;  %v352_v37 = vand.u32 2147483647, %v342_v31  ;;  %vm348_vm2 = vweird.f32 %v342_v31 }
  0xc0   : > { %v355_v39 = vor.u32 1.1754944e-38, %v354_v35  ;;  %vm353_vm5 = vcmp.eq.f32.partialorder %v352_v37, 8.507059e+37 }
  0xc4   : > { %v488_v32 = vpop.eup %487 }
  0xc5   : > { %v344_v33 = vmul.f32 %v488_v32, %v342_v31  ;;  %vm349_vm1 = vweird.f32 %v488_v32 }
  0xc6   : > { %vm350_vm4 = vmor %vm348_vm2, %vm349_vm1 }
  0xc7   : > { %v345_v34 = vsub.f32 1.0, %v344_v33 }
  0xc9   : > { %v346_v36 = vmul.f32 %v488_v32, %v345_v34 }
  0xcb   : > { %v347_v38 = vadd.f32 %v488_v32, %v346_v36 }
  0xcd   : > { %v351_v40 = vsel %vm350_vm4, %v488_v32, %v347_v38 }
  0xce   : > { %v356_v41 = vsel %vm353_vm5, %v355_v39, %v351_v40 }
  0xcf   : > { %359 = vst.msk [vmem:[%s281_s12] sm:$0x1] %vm358_vm3, %v356_v41 }
  0xd0 PF: > { %s17_s22 = sadd.s32 1, %s511_s22   ;;  %s600_s20 = smov %s507_s21 }
  0xd1   : > { %p14_p5 = scmp.ge.s32.totalorder %s17_s22, 4   ;;  %s601_s21 = smov %s603_s4 }
  0xd3   :  { %16 = sbr.rel (!%p14_p5) target bundleno = 3 (0x3), region = 73 }

// kernel: grid_attention_block_3d.5
= control target key start
LH: loop header
LB: loop body
LE: loop exit
PB: predicated region body
PF: predicated region fallthrough
CT: control target
= control target key end

     0   :  { %s1032_s21 = smov 0   ;;  %s1286_s0 = inlined_call_operand.vmem [shape: f32[2,8,512], index: 0, kind: input, shape index: {}]   ;;  %s1287_s1 = inlined_call_operand.vmem [shape: f32[2,1,512], index: 1, kind: input, shape index: {}]   ;;  %s1288_s2 = inlined_call_operand.vmem [shape: f32[8,8], index: 2, kind: input, shape index: {}]   ;;  %s1289_s3 = inlined_call_operand.vmem [shape: f32[8,1], index: 3, kind: input, shape index: {}]   ;;  %s1290_s4 = inlined_call_operand.vmem [shape: f32[8,1], index: 4, kind: input, shape index: {}]   ;;  %s1291_s5 = inlined_call_operand.vmem [shape: f32[8,1], index: 5, kind: input, shape index: {}]   ;;  %s1292_s6 = inlined_call_operand.vmem [shape: f32[2,8,512], index: 6, kind: output, shape index: {}]  }
   0x1 LB: > { %s920_s22 = sadd.s32 4294967295, %s993_s21   ;;  %p924_p0 = scmp.ge.s32.totalorder %s993_s21, 1  ;;  %s993_s21 = sphi %s1032_s21, %s16_s21  }
   0x2   : > { %p221_p1 = scmp.lt.s32.totalorder %s993_s21, 3 }
   0x4   : > { %p222_p2 = pnand %p924_p0, %p221_p1 }
   0x5   : > { %p255_p3 = scmp.lt.s32.totalorder (!%p222_p2), %s920_s22, 1 }
   0x6   : > { %225 = sbr.rel (%p222_p2) target bundleno = 1418 (0x58a), region = 44 }
   0xb   : > { %v288_v0 = vld [vmem:[%s1289_s3] sm:$0xff]  ;;  %v995_v1 = vmov 0   ;;  %s1294_s22 = smov (!%p255_p3, %s920_s22), 1  ;;  %vm294_vm0 = vcmask 64512   ;;  %vm378_vm1 = vcmask 1041408   ;;  %v996_v33 = vmov 1024.0  }
   0xc   : > { %974 = vset.pattern.permute.xlu0 %v995_v1  ;;  %975 = vset.pattern.permute.xlu2 %v995_v1  ;;  %s936_s25 = sshll.u32 %s1294_s22, 5  ;;  %s927_s26 = sshll.u32 %s1294_s22, 2  ;;  %v274_v13 = vld [vmem:[%s1288_s2] sm:$0xff]  ;;  %977 = vrcp.f32 %v996_v33 }
   0xd   : > { %291 = vperm.xlu0 %974, %v288_v0   ;;  %976 = vset.pattern.permute.xlu1 %v995_v1  ;;  %s259_s29 = scalar_lea.vmem %s1286_s0, %s936_s25  ;;  %s263_s8 = scalar_lea.vmem %s1287_s1, %s927_s26  ;;  %v577_v32 = vld [vmem:[%s1291_s5 + $0x2] sm:$0x3] }
   0xe   : > { %v271_v2 = vld [vmem:[%s259_s29 + $0x10] sm:$0xff]  ;;  %v273_v3 = vld [vmem:[%s263_s8] sm:$0xf]  ;;  %v272_v4 = vld [vmem:[%s259_s29 + $0x18] sm:$0xff] }
   0xf   : > { %v278_v5 = vperm.slane %v273_v3, 2  ;;  %v279_v6 = vperm.slane %v273_v3, 3  ;;  %v269_v7 = vld [vmem:[%s259_s29] sm:$0xff]  ;;  %v276_v8 = vperm.slane %v273_v3, 0  ;;  %v270_v9 = vld [vmem:[%s259_s29 + $0x8] sm:$0xff]  ;;  %v277_v10 = vperm.slane %v273_v3, 1 }
  0x11   : > { %v286_v11 = vmul.f32 %v278_v5, %v271_v2  ;;  %v287_v12 = vmul.f32 %v279_v6, %v272_v4  ;;  %v284_v14 = vmul.f32 %v276_v8, %v269_v7  ;;  %v285_v15 = vmul.f32 %v277_v10, %v270_v9 }
  0x12   : > { %v978_v34 = vpop.eup %977 }
  0x13   : > { %353 = vmatpush.msra.mxu2 %v286_v11  ;;  %373 = vmatpush.msra.mxu3 %v287_v12  ;;  %v396_v35 = vmul.f32 1024.0, %v978_v34  ;;  %vm400_vm2 = vweird.f32 %v978_v34 }
  0x14   : > { %932 = vmatmul.msk.f32.vlgmr.msra.gmra.mxu2 %vm294_vm0, %v274_v13  ;;  %933 = vmatmul.msk.f32.vlgmr.msra.gmra.mxu3 %vm294_vm0, %v274_v13 }
  0x15   : > { %313 = vmatpush.msra.mxu0 %v284_v14  ;;  %333 = vmatpush.msra.mxu1 %v285_v15  ;;  %v397_v36 = vsub.f32 1.0, %v396_v35 }
  0x16   : > { %930 = vmatmul.msk.f32.vlgmr.msra.gmra.mxu0 %vm294_vm0, %v274_v13  ;;  %931 = vmatmul.msk.f32.vlgmr.msra.gmra.mxu1 %vm294_vm0, %v274_v13 }
  0x17   : > { %v398_v40 = vmul.f32 %v978_v34, %v397_v36 }
  0x19   : > { %v399_v43 = vadd.f32 %v978_v34, %v398_v40 }
  0x1b   : > { %v401_v46 = vsel %vm400_vm2, %v978_v34, %v399_v43 }
  0x7f   : > { %v292_v16 = vpop.permute.xlu0 %291 }
  0x93   : > { %v315_v17 = vpop.f32.mrf.mxu0  ;;  %v335_v18 = vpop.f32.mrf.mxu1 }
  0x94   : > { %v1058_v19 = vadd.f32 %v315_v17, %v292_v16  ;;  %v1060_v20 = vadd.f32 %v335_v18, %v292_v16 }
  0x96   : > { %v379_v21 = vsel %vm378_vm1, %v1058_v19, 0.0  ;;  %v380_v22 = vsel %vm378_vm1, %v1060_v20, 0.0  ;;  %v484_v52 = vrot.slane %v1058_v19, 2  ;;  %v485_v56 = vrot.slane %v1060_v20, 2 }
  0x97   : > { %v355_v23 = vpop.f32.mrf.mxu2  ;;  %v375_v24 = vpop.f32.mrf.mxu3  ;;  %v381_v25 = vadd.f32 %v380_v22, %v379_v21 }
  0x98   : > { %v1066_v26 = vadd.f32 %v355_v23, %v292_v16  ;;  %v1068_v27 = vadd.f32 %v375_v24, %v292_v16  ;;  %v492_v63 = vsel %vm378_vm1, %v484_v52, 0.0  ;;  %v493_v0 = vsel %vm378_vm1, %v485_v56, 0.0 }
  0x99   : > { %v494_v4 = vadd.f32 %v493_v0, %v492_v63 }
  0x9a   : > { %v382_v28 = vsel %vm378_vm1, %v1066_v26, 0.0  ;;  %v384_v30 = vsel %vm378_vm1, %v1068_v27, 0.0  ;;  %v486_v62 = vrot.slane %v1066_v26, 2  ;;  %v487_v6 = vrot.slane %v1068_v27, 2 }
  0x9b   : > { %v383_v29 = vadd.f32 %v382_v28, %v381_v25 }
  0x9c   : > { %v495_v5 = vsel %vm378_vm1, %v486_v62, 0.0  ;;  %v497_v8 = vsel %vm378_vm1, %v487_v6, 0.0 }
  0x9d   : > { %v385_v31 = vadd.f32 %v384_v30, %v383_v29  ;;  %v496_v7 = vadd.f32 %v495_v5, %v494_v4  ;;  %v731_v4 = vrot.slane %v1060_v20, 6  ;;  %v610_v5 = vrot.slane %v1068_v27, 4 }
  0x9f   : > { %386 = vadd.xlane.f32.xlu0 %v385_v31  ;;  %v498_v9 = vadd.f32 %v497_v8, %v496_v7  ;;  %v732_v7 = vrot.slane %v1066_v26, 6 }
  0xb3   : > { %595 = vperm.xlu0 %974, %v577_v32  }
 0x112   : > { %v387_v37 = vpop.xlane.xlu0 %386 }
 0x113   : > { %v388_v38 = vrot.slane %v387_v37, 4 }
 0x115   : > { %v389_v39 = vadd.f32 %v388_v38, %v387_v37 }
 0x117   : > { %v390_v41 = vrot.slane %v389_v39, 2 }
 0x119   : > { %v391_v42 = vadd.f32 %v390_v41, %v389_v39 }
 0x11b   : > { %v392_v44 = vrot.slane %v391_v42, 1 }
 0x11d   : > { %v393_v45 = vadd.f32 %v392_v44, %v391_v42 }
 0x11f   : > { %938 = vpush %v393_v45  ;;  %v607_v45 = vrot.slane %v1058_v19, 4 }
 0x120   : > { %940 = vpush %v401_v46 }
 0x150   : > { %s939_s13 = spop %938 }
 0x151   : > { %s1077_s14 = spop %940 }
 0x152   : > { %s403_s15 = smul.f32 %s1077_s14, %s939_s13  ;;  %s1177_s13 = scalar_lea.vmem %s1292_s6, %s936_s25 }
 0x154   : > { %v404_v47 = vstv %s403_s15 }
 0x155   : > { %v1081_v48 = vsub.f32 %v1058_v19, %v404_v47  ;;  %v1084_v49 = vsub.f32 %v1060_v20, %v404_v47  ;;  %v1087_v50 = vsub.f32 %v1066_v26, %v404_v47  ;;  %v1090_v51 = vsub.f32 %v1068_v27, %v404_v47 }
 0x157   : > { %v409_v53 = vmul.f32 %v1081_v48, %v1081_v48  ;;  %v410_v54 = vmul.f32 %v1084_v49, %v1084_v49  ;;  %v411_v55 = vmul.f32 %v1087_v50, %v1087_v50  ;;  %v412_v57 = vmul.f32 %v1090_v51, %v1090_v51 }
 0x159   : > { %v413_v58 = vsel %vm378_vm1, %v409_v53, 0.0  ;;  %v414_v59 = vsel %vm378_vm1, %v410_v54, 0.0  ;;  %v416_v61 = vsel %vm378_vm1, %v411_v55, 0.0  ;;  %v418_v2 = vsel %vm378_vm1, %v412_v57, 0.0 }
 0x15a   : > { %v415_v60 = vadd.f32 %v414_v59, %v413_v58  ;;  %v608_v53 = vrot.slane %v1060_v20, 4  ;;  %v609_v59 = vrot.slane %v1066_v26, 4 }
 0x15c   : > { %v417_v1 = vadd.f32 %v416_v61, %v415_v60  ;;  %v615_v60 = vsel %vm378_vm1, %v607_v45, 0.0  ;;  %v616_v61 = vsel %vm378_vm1, %v608_v53, 0.0 }
 0x15e   : > { %v419_v3 = vadd.f32 %v418_v2, %v417_v1  ;;  %v617_v1 = vadd.f32 %v616_v61, %v615_v60  ;;  %v618_v2 = vsel %vm378_vm1, %v609_v59, 0.0 }
 0x160   : > { %420 = vadd.xlane.f32.xlu1 %v419_v3  ;;  %v730_v3 = vrot.slane %v1058_v19, 6  ;;  %v619_v6 = vadd.f32 %v618_v2, %v617_v1 }
 0x162   : > { %v738_v8 = vsel %vm378_vm1, %v730_v3, 0.0 }
 0x168   : > { %499 = vadd.xlane.f32.xlu1 %v498_v9  ;;  %v739_v9 = vsel %vm378_vm1, %v731_v4, 0.0 }
 0x1d3   : > { %v421_v10 = vpop.xlane.xlu1 %420 }
 0x1d4   : > { %v422_v11 = vrot.slane %v421_v10, 4 }
 0x1d6   : > { %v423_v12 = vadd.f32 %v422_v11, %v421_v10  ;;  %v620_v10 = vsel %vm378_vm1, %v610_v5, 0.0 }
 0x1d7   : > { %v621_v11 = vadd.f32 %v620_v10, %v619_v6 }
 0x1d8   : > { %v424_v13 = vrot.slane %v423_v12, 2 }
 0x1da   : > { %v425_v14 = vadd.f32 %v424_v13, %v423_v12  ;;  %v740_v12 = vadd.f32 %v739_v9, %v738_v8  ;;  %v741_v13 = vsel %vm378_vm1, %v732_v7, 0.0 }
 0x1db   : > { %v500_v17 = vpop.xlane.xlu1 %499 }
 0x1dc   : > { %v426_v15 = vrot.slane %v425_v14, 1  ;;  %v501_v18 = vrot.slane %v500_v17, 4 }
 0x1de   : > { %v427_v16 = vadd.f32 %v426_v15, %v425_v14  ;;  %v502_v22 = vadd.f32 %v501_v18, %v500_v17  ;;  %v733_v14 = vrot.slane %v1068_v27, 6  ;;  %v742_v15 = vadd.f32 %v741_v13, %v740_v12  ;;  %v451_v18 = vld [vmem:[%s1290_s4] sm:$0x3] }
 0x1e0   : > { %942 = vpush %v427_v16  ;;  %v503_v23 = vrot.slane %v502_v22, 2  ;;  %v743_v16 = vsel %vm378_vm1, %v733_v14, 0.0 }
 0x1e1   : > { %v744_v17 = vadd.f32 %v743_v16, %v742_v15 }
 0x1e2   : > { %v504_v29 = vadd.f32 %v503_v23, %v502_v22 }
 0x1e4   : > { %v505_v32 = vrot.slane %v504_v29, 1 }
 0x1e6   : > { %v506_v35 = vadd.f32 %v505_v32, %v504_v29 }
 0x211   : > { %s943_s16 = spop %942 }
 0x212   : > { %s437_s17 = smul.f32 %s943_s16, %s1077_s14 }
 0x214   : > { %s438_s18 = sadd.f32 1e-05, %s437_s17 }
 0x216   : > { %v439_v21 = vstv %s438_s18 }
 0x217   : > { %979 = vrsqrt.f32 %v439_v21  ;;  %vm446_vm4 = vweird.f32 %v439_v21 }
 0x21d   : > { %v980_v24 = vpop.eup %979 }
 0x21e   : > { %v441_v25 = vmul.f32 %v980_v24, %v439_v21  ;;  %vm447_vm3 = vweird.f32 %v980_v24  ;;  %v576_v21 = vld [vmem:[%s1290_s4 + $0x2] sm:$0x3] }
 0x21f   : > { %vm448_vm5 = vmor %vm446_vm4, %vm447_vm3 }
 0x220   : > { %v442_v28 = vmul.f32 %v980_v24, %v441_v25 }
 0x222   : > { %v443_v30 = vmul.f32 0.5, %v442_v28 }
 0x224   : > { %v444_v31 = vsub.f32 1.5, %v443_v30 }
 0x226   : > { %v445_v33 = vmul.f32 %v980_v24, %v444_v31 }
 0x228   : > { %v449_v34 = vsel %vm448_vm5, %v980_v24, %v445_v33 }
 0x229   : > { %944 = vpush %v449_v34 }
 0x22a   : > { %946 = vpush %v506_v35 }
 0x25a   : > { %s1113_s19 = spop %944 }
 0x25b   : > { %s947_s20 = spop %946 }
 0x25c   : > { %s516_s23 = smul.f32 %s947_s20, %s1077_s14 }
 0x25e   : > { %v517_v36 = vstv %s516_s23 }
 0x25f   : > { %v1117_v37 = vsub.f32 %v1058_v19, %v517_v36  ;;  %v1120_v38 = vsub.f32 %v1060_v20, %v517_v36  ;;  %v1123_v39 = vsub.f32 %v1066_v26, %v517_v36  ;;  %v1126_v40 = vsub.f32 %v1068_v27, %v517_v36 }
 0x261   : > { %v522_v41 = vmul.f32 %v1117_v37, %v1117_v37  ;;  %v523_v42 = vmul.f32 %v1120_v38, %v1120_v38  ;;  %v524_v43 = vmul.f32 %v1123_v39, %v1123_v39  ;;  %v525_v44 = vmul.f32 %v1126_v40, %v1126_v40 }
 0x263   : > { %v530_v46 = vrot.slane %v522_v41, 2  ;;  %v531_v47 = vrot.slane %v523_v42, 2  ;;  %v532_v52 = vrot.slane %v524_v43, 2  ;;  %v533_v54 = vrot.slane %v525_v44, 2 }
 0x265   : > { %v538_v55 = vsel %vm378_vm1, %v530_v46, 0.0  ;;  %v539_v56 = vsel %vm378_vm1, %v531_v47, 0.0  ;;  %v541_v58 = vsel %vm378_vm1, %v532_v52, 0.0  ;;  %v543_v63 = vsel %vm378_vm1, %v533_v54, 0.0 }
 0x266   : > { %v540_v57 = vadd.f32 %v539_v56, %v538_v55 }
 0x268   : > { %v542_v62 = vadd.f32 %v541_v58, %v540_v57  ;;  %v596_v57 = vpop.permute.xlu0 %595 }
 0x26a   : > { %v544_v0 = vadd.f32 %v543_v63, %v542_v62 }
 0x26c   : > { %545 = vadd.xlane.f32.xlu2 %v544_v0  ;;  %v597_v0 = vrot.slane %v596_v57, 6 }
 0x274   : > { %622 = vadd.xlane.f32.xlu2 %v621_v11 }
 0x27c   : > { %745 = vadd.xlane.f32.xlu2 %v744_v17 }
 0x294   : > { %460 = vperm.xlu2 %975, %v451_v18  }
 0x29c   : > { %585 = vperm.xlu2 %975, %v576_v21  }
 0x2df   : > { %v546_v22 = vpop.xlane.xlu2 %545 }
 0x2e0   : > { %v547_v23 = vrot.slane %v546_v22, 4 }
 0x2e2   : > { %v548_v24 = vadd.f32 %v547_v23, %v546_v22 }
 0x2e4   : > { %v549_v25 = vrot.slane %v548_v24, 2 }
 0x2e6   : > { %v550_v28 = vadd.f32 %v549_v25, %v548_v24 }
 0x2e7   : > { %v623_v31 = vpop.xlane.xlu2 %622 }
 0x2e8   : > { %v551_v29 = vrot.slane %v550_v28, 1  ;;  %v624_v32 = vrot.slane %v623_v31, 4 }
 0x2ea   : > { %v552_v30 = vadd.f32 %v551_v29, %v550_v28  ;;  %v625_v34 = vadd.f32 %v624_v32, %v623_v31  ;;  %v699_v29 = vld [vmem:[%s1290_s4 + $0x4] sm:$0x3] }
 0x2eb   : > { %708 = vperm.xlu2 %975, %v699_v29  }
 0x2ec   : > { %948 = vpush %v552_v30  ;;  %v626_v35 = vrot.slane %v625_v34, 2 }
 0x2ee   : > { %v627_v43 = vadd.f32 %v626_v35, %v625_v34 }
 0x2ef   : > { %v1163_v54 = vpop.xlane.xlu2 %745 }
 0x2f0   : > { %v628_v46 = vrot.slane %v627_v43, 1 }
 0x2f2   : > { %v629_v53 = vadd.f32 %v628_v46, %v627_v43 }
 0x2f7   : > { %v1165_v55 = vpop.permute.xlu2 %460 }
 0x2ff   : > { %v586_v56 = vpop.permute.xlu2 %585 }
 0x300   : > { %v587_v58 = vrot.slane %v586_v56, 6 }
 0x31d   : > { %s949_s29 = spop %948 }
 0x31e   : > { %s562_s30 = smul.f32 %s949_s29, %s1077_s14 }
 0x320   : > { %s563_s7 = sadd.f32 1e-05, %s562_s30 }
 0x322   : > { %v564_v33 = vstv %s563_s7 }
 0x323   : > { %981 = vrsqrt.f32 %v564_v33  ;;  %vm571_vm7 = vweird.f32 %v564_v33 }
 0x329   : > { %v982_v36 = vpop.eup %981 }
 0x32a   : > { %v566_v41 = vmul.f32 %v982_v36, %v564_v33  ;;  %vm572_vm6 = vweird.f32 %v982_v36 }
 0x32b   : > { %vm573_vm8 = vmor %vm571_vm7, %vm572_vm6 }
 0x32c   : > { %v567_v42 = vmul.f32 %v982_v36, %v566_v41  ;;  %v747_v41 = vrot.slane %v1163_v54, 4 }
 0x32e   : > { %v568_v44 = vmul.f32 0.5, %v567_v42  ;;  %v748_v43 = vadd.f32 %v747_v41, %v1163_v54 }
 0x330   : > { %v569_v45 = vsub.f32 1.5, %v568_v44  ;;  %v749_v44 = vrot.slane %v748_v43, 2 }
 0x332   : > { %v570_v47 = vmul.f32 %v982_v36, %v569_v45 }
 0x334   : > { %v574_v52 = vsel %vm573_vm8, %v982_v36, %v570_v47 }
 0x335   : > { %950 = vpush %v574_v52  ;;  %v750_v52 = vadd.f32 %v749_v44, %v748_v43 }
 0x336   : > { %952 = vpush %v629_v53 }
 0x337   : > { %v751_v57 = vrot.slane %v750_v52, 1 }
 0x366   : > { %s951_s8 = spop %950 }
 0x367   : > { %v578_v59 = vstv %s951_s8  ;;  %s953_s9 = spop %952 }
 0x368   : > { %v579_v60 = vmul.f32 %v578_v59, %v1117_v37  ;;  %v580_v61 = vmul.f32 %v578_v59, %v1120_v38  ;;  %v581_v62 = vmul.f32 %v578_v59, %v1123_v39  ;;  %v582_v63 = vmul.f32 %v578_v59, %v1126_v40  ;;  %s639_s10 = smul.f32 %s953_s9, %s1077_s14 }
 0x36a   : > { %v640_v1 = vstv %s639_s10  ;;  %v589_v2 = vmul.f32 %v587_v58, %v579_v60  ;;  %v590_v3 = vmul.f32 %v587_v58, %v580_v61  ;;  %v591_v4 = vmul.f32 %v587_v58, %v581_v62 }
 0x36b   : > { %v1180_v37 = vsub.f32 %v1058_v19, %v640_v1  ;;  %v1183_v38 = vsub.f32 %v1060_v20, %v640_v1  ;;  %v1186_v39 = vsub.f32 %v1066_v26, %v640_v1  ;;  %v1189_v40 = vsub.f32 %v1068_v27, %v640_v1 }
 0x36c   : > { %v592_v5 = vmul.f32 %v587_v58, %v582_v63  ;;  %v599_v6 = vadd.f32 %v597_v0, %v589_v2  ;;  %v600_v7 = vadd.f32 %v597_v0, %v590_v3  ;;  %v601_v8 = vadd.f32 %v597_v0, %v591_v4 }
 0x36d   : > { %v645_v9 = vmul.f32 %v1180_v37, %v1180_v37  ;;  %v646_v10 = vmul.f32 %v1183_v38, %v1183_v38  ;;  %v647_v11 = vmul.f32 %v1186_v39, %v1186_v39  ;;  %v648_v12 = vmul.f32 %v1189_v40, %v1189_v40 }
 0x36e   : > { %v602_v13 = vadd.f32 %v597_v0, %v592_v5  ;;  %603 = vst [vmem:[%s1177_s13] sm:$0xc] %v599_v6  ;;  %v752_v60 = vadd.f32 %v751_v57, %v750_v52 }
 0x36f   : > { %v653_v14 = vrot.slane %v645_v9, 4  ;;  %v654_v15 = vrot.slane %v646_v10, 4  ;;  %604 = vst [vmem:[%s1177_s13 + $0x8] sm:$0xc] %v600_v7  ;;  %v655_v16 = vrot.slane %v647_v11, 4  ;;  %v656_v17 = vrot.slane %v648_v12, 4 }
 0x370   : > { %605 = vst [vmem:[%s1177_s13 + $0x10] sm:$0xc] %v601_v8  ;;  %v452_v12 = vld [vmem:[%s1291_s5] sm:$0x3] }
 0x371   : > { %606 = vst [vmem:[%s1177_s13 + $0x18] sm:$0xc] %v602_v13  ;;  %v661_v18 = vsel %vm378_vm1, %v653_v14, 0.0  ;;  %v662_v21 = vsel %vm378_vm1, %v654_v15, 0.0  ;;  %v664_v23 = vsel %vm378_vm1, %v655_v16, 0.0  ;;  %v666_v25 = vsel %vm378_vm1, %v656_v17, 0.0 }
 0x372   : > { %v663_v22 = vadd.f32 %v662_v21, %v661_v18  ;;  %v700_v13 = vld [vmem:[%s1291_s5 + $0x4] sm:$0x3]  ;;  %v823_v14 = vld [vmem:[%s1291_s5 + $0x6] sm:$0x3] }
 0x373   : > { %v822_v15 = vld [vmem:[%s1290_s4 + $0x6] sm:$0x3] }
 0x374   : > { %v665_v24 = vadd.f32 %v664_v23, %v663_v22  ;;  %831 = vperm.xlu2 %975, %v822_v15  }
 0x376   : > { %v667_v28 = vadd.f32 %v666_v25, %v665_v24  ;;  %v453_v25 = vstv %s1113_s19 }
 0x377   : > { %v455_v29 = vmul.f32 %v453_v25, %v1084_v49  ;;  %v709_v49 = vpop.permute.xlu2 %708 }
 0x378   : > { %668 = vadd.xlane.f32.xlu1 %v667_v28  ;;  %v454_v28 = vmul.f32 %v453_v25, %v1081_v48 }
 0x3eb   : > { %v669_v30 = vpop.xlane.xlu1 %668 }
 0x3ec   : > { %v670_v31 = vrot.slane %v669_v30, 4 }
 0x3ee   : > { %v671_v32 = vadd.f32 %v670_v31, %v669_v30  ;;  %v456_v30 = vmul.f32 %v453_v25, %v1087_v50  ;;  %v457_v31 = vmul.f32 %v453_v25, %v1090_v51 }
 0x3f0   : > { %v672_v33 = vrot.slane %v671_v32, 2 }
 0x3f2   : > { %v673_v34 = vadd.f32 %v672_v33, %v671_v32  ;;  %v463_v32 = vmul.f32 %v1165_v55, %v454_v28  ;;  %v464_v33 = vmul.f32 %v1165_v55, %v455_v29 }
 0x3f4   : > { %v674_v35 = vrot.slane %v673_v34, 1 }
 0x3f6   : > { %v675_v36 = vadd.f32 %v674_v35, %v673_v34  ;;  %v465_v34 = vmul.f32 %v1165_v55, %v456_v30  ;;  %v466_v35 = vmul.f32 %v1165_v55, %v457_v31 }
 0x3f8   : > { %954 = vpush %v675_v36 }
 0x429   : > { %s955_s15 = spop %954 }
 0x42a   : > { %s685_s16 = smul.f32 %s955_s15, %s1077_s14 }
 0x42c   : > { %s686_s17 = sadd.f32 1e-05, %s685_s16 }
 0x42e   : > { %v687_v42 = vstv %s686_s17 }
 0x42f   : > { %983 = vrsqrt.f32 %v687_v42  ;;  %vm694_vm10 = vweird.f32 %v687_v42 }
 0x435   : > { %v984_v45 = vpop.eup %983 }
 0x436   : > { %v689_v46 = vmul.f32 %v984_v45, %v687_v42  ;;  %vm695_vm9 = vweird.f32 %v984_v45 }
 0x437   : > { %vm696_vm11 = vmor %vm694_vm10, %vm695_vm9 }
 0x438   : > { %v690_v47 = vmul.f32 %v984_v45, %v689_v46  ;;  %v710_v46 = vrot.slane %v709_v49, 4 }
 0x43a   : > { %v691_v53 = vmul.f32 0.5, %v690_v47 }
 0x43c   : > { %v692_v56 = vsub.f32 1.5, %v691_v53 }
 0x43e   : > { %v693_v58 = vmul.f32 %v984_v45, %v692_v56 }
 0x440   : > { %v697_v59 = vsel %vm696_vm11, %v984_v45, %v693_v58 }
 0x441   : > { %956 = vpush %v697_v59 }
 0x442   : > { %958 = vpush %v752_v60 }
 0x472   : > { %s1213_s18 = spop %956 }
 0x473   : > { %s959_s20 = spop %958  ;;  %v701_v43 = vstv %s1213_s18 }
 0x474   : > { %s762_s23 = smul.f32 %s959_s20, %s1077_s14  ;;  %v702_v50 = vmul.f32 %v701_v43, %v1180_v37  ;;  %v703_v51 = vmul.f32 %v701_v43, %v1183_v38  ;;  %v704_v45 = vmul.f32 %v701_v43, %v1186_v39  ;;  %v705_v55 = vmul.f32 %v701_v43, %v1189_v40 }
 0x476   : > { %v763_v54 = vstv %s762_s23  ;;  %v712_v52 = vmul.f32 %v710_v46, %v702_v50  ;;  %v713_v53 = vmul.f32 %v710_v46, %v703_v51  ;;  %v714_v56 = vmul.f32 %v710_v46, %v704_v45 }
 0x477   : > { %v1217_v61 = vsub.f32 %v1058_v19, %v763_v54  ;;  %v1220_v62 = vsub.f32 %v1060_v20, %v763_v54  ;;  %v1223_v63 = vsub.f32 %v1066_v26, %v763_v54  ;;  %v1226_v0 = vsub.f32 %v1068_v27, %v763_v54 }
 0x478   : > { %v715_v37 = vmul.f32 %v710_v46, %v705_v55 }
 0x479   : > { %v768_v1 = vmul.f32 %v1217_v61, %v1217_v61  ;;  %v769_v2 = vmul.f32 %v1220_v62, %v1220_v62  ;;  %v770_v3 = vmul.f32 %v1223_v63, %v1223_v63  ;;  %v771_v19 = vmul.f32 %v1226_v0, %v1226_v0 }
 0x47b   : > { %v776_v20 = vrot.slane %v768_v1, 6  ;;  %v777_v4 = vrot.slane %v769_v2, 6  ;;  %v778_v5 = vrot.slane %v770_v3, 6  ;;  %v779_v26 = vrot.slane %v771_v19, 6 }
 0x47d   : > { %v784_v6 = vsel %vm378_vm1, %v776_v20, 0.0  ;;  %v785_v27 = vsel %vm378_vm1, %v777_v4, 0.0  ;;  %v787_v8 = vsel %vm378_vm1, %v778_v5, 0.0  ;;  %v789_v10 = vsel %vm378_vm1, %v779_v26, 0.0  ;;  %v832_v4 = vpop.permute.xlu2 %831 }
 0x47e   : > { %v786_v7 = vadd.f32 %v785_v27, %v784_v6  ;;  %v833_v26 = vrot.slane %v832_v4, 2 }
 0x480   : > { %v788_v9 = vadd.f32 %v787_v8, %v786_v7 }
 0x482   : > { %v790_v11 = vadd.f32 %v789_v10, %v788_v9 }
 0x484   : > { %791 = vadd.xlane.f32.xlu1 %v790_v11 }
 0x49d   : > { %469 = vperm.xlu1 %976, %v452_v12  }
 0x4a5   : > { %718 = vperm.xlu1 %976, %v700_v13  }
 0x4ad   : > { %841 = vperm.xlu1 %976, %v823_v14  }
 0x4f7   : > { %v792_v16 = vpop.xlane.xlu1 %791 }
 0x4f8   : > { %v793_v17 = vrot.slane %v792_v16, 4 }
 0x4fa   : > { %v794_v18 = vadd.f32 %v793_v17, %v792_v16 }
 0x4fc   : > { %v795_v21 = vrot.slane %v794_v18, 2 }
 0x4fe   : > { %v796_v22 = vadd.f32 %v795_v21, %v794_v18 }
 0x500   : > { %v797_v23 = vrot.slane %v796_v22, 1 }
 0x502   : > { %v798_v24 = vadd.f32 %v797_v23, %v796_v22 }
 0x504   : > { %960 = vpush %v798_v24 }
 0x50f   : > { %v470_v36 = vpop.permute.xlu1 %469 }
 0x510   : > { %v472_v41 = vadd.f32 %v470_v36, %v463_v32  ;;  %v473_v48 = vadd.f32 %v470_v36, %v464_v33  ;;  %v474_v42 = vadd.f32 %v470_v36, %v465_v34  ;;  %v475_v44 = vadd.f32 %v470_v36, %v466_v35 }
 0x512   : > { %476 = vst [vmem:[%s1177_s13] sm:$0x3] %v472_v41 }
 0x513   : > { %477 = vst [vmem:[%s1177_s13 + $0x8] sm:$0x3] %v473_v48 }
 0x514   : > { %478 = vst [vmem:[%s1177_s13 + $0x10] sm:$0x3] %v474_v42 }
 0x515   : > { %479 = vst [vmem:[%s1177_s13 + $0x18] sm:$0x3] %v475_v44 }
 0x517   : > { %v719_v47 = vpop.permute.xlu1 %718 }
 0x518   : > { %v720_v57 = vrot.slane %v719_v47, 4 }
 0x51a   : > { %v722_v58 = vadd.f32 %v720_v57, %v712_v52  ;;  %v723_v38 = vadd.f32 %v720_v57, %v713_v53  ;;  %v724_v59 = vadd.f32 %v720_v57, %v714_v56  ;;  %v725_v60 = vadd.f32 %v720_v57, %v715_v37 }
 0x51c   : > { %726 = vst [vmem:[%s1177_s13] sm:$0x30] %v722_v58 }
 0x51d   : > { %727 = vst [vmem:[%s1177_s13 + $0x8] sm:$0x30] %v723_v38 }
 0x51e   : > { %728 = vst [vmem:[%s1177_s13 + $0x10] sm:$0x30] %v724_v59 }
 0x51f   : > { %729 = vst [vmem:[%s1177_s13 + $0x18] sm:$0x30] %v725_v60  ;;  %v842_v5 = vpop.permute.xlu1 %841 }
 0x520   : > { %v843_v10 = vrot.slane %v842_v5, 2 }
 0x535   : > { %s961_s19 = spop %960 }
 0x536   : > { %s808_s9 = smul.f32 %s961_s19, %s1077_s14 }
 0x538   : > { %s809_s10 = sadd.f32 1e-05, %s808_s9 }
 0x53a   : > { %v810_v39 = vstv %s809_s10 }
 0x53b   : > { %985 = vrsqrt.f32 %v810_v39  ;;  %vm817_vm13 = vweird.f32 %v810_v39 }
 0x541   : > { %v986_v40 = vpop.eup %985 }
 0x542   : > { %v812_v54 = vmul.f32 %v986_v40, %v810_v39  ;;  %vm818_vm12 = vweird.f32 %v986_v40 }
 0x543   : > { %vm819_vm14 = vmor %vm817_vm13, %vm818_vm12 }
 0x544   : > { %v813_v1 = vmul.f32 %v986_v40, %v812_v54 }
 0x546   : > { %v814_v2 = vmul.f32 0.5, %v813_v1 }
 0x548   : > { %v815_v3 = vsub.f32 1.5, %v814_v2 }
 0x54a   : > { %v816_v19 = vmul.f32 %v986_v40, %v815_v3 }
 0x54c   : > { %v820_v20 = vsel %vm819_vm14, %v986_v40, %v816_v19 }
 0x54d   : > { %962 = vpush %v820_v20 }
 0x57e   : > { %s963_s11 = spop %962 }
 0x57f   : > { %v824_v6 = vstv %s963_s11 }
 0x580   : > { %v825_v27 = vmul.f32 %v824_v6, %v1217_v61  ;;  %v826_v7 = vmul.f32 %v824_v6, %v1220_v62  ;;  %v827_v8 = vmul.f32 %v824_v6, %v1223_v63  ;;  %v828_v9 = vmul.f32 %v824_v6, %v1226_v0 }
 0x582   : > { %v835_v11 = vmul.f32 %v833_v26, %v825_v27  ;;  %v836_v12 = vmul.f32 %v833_v26, %v826_v7  ;;  %v837_v13 = vmul.f32 %v833_v26, %v827_v8  ;;  %v838_v14 = vmul.f32 %v833_v26, %v828_v9 }
 0x584   : > { %v845_v15 = vadd.f32 %v843_v10, %v835_v11  ;;  %v846_v16 = vadd.f32 %v843_v10, %v836_v12  ;;  %v847_v17 = vadd.f32 %v843_v10, %v837_v13  ;;  %v848_v18 = vadd.f32 %v843_v10, %v838_v14 }
 0x586   : > { %849 = vst [vmem:[%s1177_s13] sm:$0xc0] %v845_v15 }
 0x587   : > { %850 = vst [vmem:[%s1177_s13 + $0x8] sm:$0xc0] %v846_v16 }
 0x588   : > { %851 = vst [vmem:[%s1177_s13 + $0x10] sm:$0xc0] %v847_v17 }
 0x589   : > { %852 = vst [vmem:[%s1177_s13 + $0x18] sm:$0xc0] %v848_v18 }
 0x58a PF: > { %s16_s21 = sadd.s32 1, %s993_s21  }
 0x58b   : > { %p13_p4 = scmp.ge.s32.totalorder %s16_s21, 4  }
 0x58d   :  { %15 = sbr.rel (!%p13_p4) target bundleno = 1 (0x1), region = 77 }

</bundles_post_ra>
